<compile_context>
chip_gen: v7x
topology: tpu7x:2x2x1
jax: 0.10.0
libtpu: 0.0.40
codegen_flags: <defaults>
</compile_context>

<pallas_src>
import functools

import jax
import jax.numpy as jnp
from jax.experimental import pallas as pl
from jax.experimental.pallas import tpu as pltpu

LANES = 128
MAX_TILE_ROWS = 2048  # (2048, 128) f32 tile = 1 MiB


def _round_up(x, n):
    return ((x + n - 1) // n) * n


def _hdr_loss_kernel(pred_ref, tgt_ref, out_ref, acc_ref, *,
                     mu, m_rows, tile_rows, needs_mask):
    """Accumulate sum(|tone(pred) - tone(target)|) for one outer chunk.

    Grid = (n_outer, n_inner). Outer axis is "parallel" (multi-TC sharding on
    v7x); inner axis is "arbitrary" and carries a per-lane VMEM accumulator.
    The per-chunk scalar sum is written to SMEM out[o, 0] on the last inner
    step only.
    """
    i = pl.program_id(1)

    @pl.when(i == 0)
    def _():
        acc_ref[...] = jnp.zeros_like(acc_ref)

    mu_f = jnp.float32(mu)
    inv_log1p_mu = 1.0 / jnp.log1p(mu_f)
    diff = jnp.abs(jnp.log1p(mu_f * pred_ref[...]) -
                   jnp.log1p(mu_f * tgt_ref[...])) * inv_log1p_mu

    if needs_mask:
        # Unclamped global tile id: rows past the real data (ragged last tile
        # or over-covered duplicate tiles) are zeroed before accumulating.
        tile_id = pl.program_id(0) * pl.num_programs(1) + i
        row_ids = tile_id * tile_rows + jax.lax.broadcasted_iota(
            jnp.int32, diff.shape, 0)
        diff = jnp.where(row_ids < m_rows, diff, 0.0)

    acc_ref[...] += diff  # pure VPU per-lane partial sums

    @pl.when(i == pl.num_programs(1) - 1)
    def _():
        out_ref[0, 0] = jnp.sum(acc_ref[...])  # one XLU reduce per chunk


def hdr_loss(pred, target, mu=5000):
    assert pred.shape == target.shape
    n_elems = pred.size
    assert n_elems > 0

    pred_f = pred.astype(jnp.float32).reshape(-1)
    tgt_f = target.astype(jnp.float32).reshape(-1)

    rem = n_elems % LANES
    if rem:
        # Small-tail fallback: pad < 128 zeros so the slab is (m, 128).
        # log1p(0) == 0 on both sides -> padding contributes 0 to the sum.
        pad = LANES - rem
        pred_f = jnp.pad(pred_f, (0, pad))
        tgt_f = jnp.pad(tgt_f, (0, pad))

    m = pred_f.size // LANES                 # rows of the (m, 128) slab
    pred_2d = pred_f.reshape(m, LANES)       # free reshape (contiguous)
    tgt_2d = tgt_f.reshape(m, LANES)

    tile_rows = min(MAX_TILE_ROWS, _round_up(m, 8))
    total_tiles = pl.cdiv(m, tile_rows)
    n_outer = min(2, total_tiles)            # shard across 2 TCs on v7x
    n_inner = pl.cdiv(total_tiles, n_outer)

    # Mask needed if the last tile is ragged or the 2-D grid over-covers.
    needs_mask = (total_tiles * tile_rows != m) or (n_outer * n_inner != total_tiles)

    def in_map(o, i):
        t = o * n_inner + i
        return (jnp.minimum(t, total_tiles - 1), 0)  # clamp over-coverage

    kernel = functools.partial(
        _hdr_loss_kernel, mu=mu, m_rows=m, tile_rows=tile_rows,
        needs_mask=needs_mask)

    partials = pl.pallas_call(
        kernel,
        out_shape=jax.ShapeDtypeStruct((n_outer, 1), jnp.float32),
        grid_spec=pltpu.PrefetchScalarGridSpec(
            num_scalar_prefetch=0,
            grid=(n_outer, n_inner),
            in_specs=[
                pl.BlockSpec((tile_rows, LANES), in_map),
                pl.BlockSpec((tile_rows, LANES), in_map),
            ],
            out_specs=pl.BlockSpec((1, 1), lambda o, i: (o, 0),
                                   memory_space=pltpu.SMEM),
            scratch_shapes=[pltpu.VMEM((tile_rows, LANES), jnp.float32)],
        ),
        compiler_params=pltpu.CompilerParams(
            dimension_semantics=("parallel", "arbitrary")),
    )(pred_2d, tgt_2d)

    return jnp.sum(partials) / jnp.float32(n_elems)


def hdr_loss_ref(pred, target, mu=5000):
    denom = jnp.log1p(jnp.float32(mu))
    pred_tone = jnp.log1p(mu * pred) / denom
    tgt_tone = jnp.log1p(mu * target) / denom
    return jnp.mean(jnp.abs(pred_tone - tgt_tone))


if __name__ == "__main__":
    key = jax.random.PRNGKey(0)
    shapes = [
        (2, 4, 16, 16),      # base NCHW case: single tile, no mask
        (2, 3, 37, 23),      # ragged numel (% 128 != 0): small tail pad
        (2, 4, 256, 256),    # two chunks: exercises the "parallel" outer axis
        (1, 1, 2048, 320),   # odd tile count: clamped over-coverage + mask
    ]
    for shape in shapes:
        key, k1, k2 = jax.random.split(key, 3)
        pred = jax.random.uniform(k1, shape, dtype=jnp.float32)
        target = jax.random.uniform(k2, shape, dtype=jnp.float32)

        loss = jax.block_until_ready(hdr_loss(pred, target, mu=5000))
        ref = hdr_loss_ref(pred, target, mu=5000)
        assert jnp.allclose(loss, ref, rtol=1e-5, atol=1e-6), (shape, loss, ref)

    print("KERNEL_OK")
</pallas_src>

<mosaic_0001>
module attributes {stable_mosaic.version = 11 : i64} {
  func.func @_hdr_loss_kernel(%arg0: i32, %arg1: i32, %arg2: memref<16x128xf32, #tpu.memory_space<vmem>>, %arg3: memref<16x128xf32, #tpu.memory_space<vmem>>, %arg4: memref<1x1xf32, #tpu.memory_space<smem>>, %arg5: memref<16x128xf32, #tpu.memory_space<vmem>>) attributes {dimension_semantics = [#tpu.dimension_semantics<parallel>, #tpu.dimension_semantics<arbitrary>], iteration_bounds = array<i64: 1, 1>, scalar_prefetch = 0 : i64, scratch_operands = 1 : i64, tpu.core_type = #tpu.core_type<tc>, window_params = [{transform_indices = @transform_0, window_bounds = array<i64: 16, 128>}, {transform_indices = @transform_1, window_bounds = array<i64: 16, 128>}, {transform_indices = @transform_2, window_bounds = array<i64: 1, 1>}]} {
    %c0_i32 = arith.constant 0 : i32
    %0 = arith.cmpi eq, %arg1, %c0_i32 : i32
    %1 = arith.extui %0 : i1 to i32
    %c0_i32_0 = arith.constant 0 : i32
    %2 = arith.cmpi ne, %1, %c0_i32_0 : i32
    scf.if %2 {
      %cst_13 = arith.constant 0.000000e+00 : f32
      %23 = vector.broadcast %cst_13 : f32 to vector<16x128xf32>
      %c0_14 = arith.constant 0 : index
      %c0_15 = arith.constant 0 : index
      %24 = vector.load %arg5[%c0_14, %c0_15] : memref<16x128xf32, #tpu.memory_space<vmem>>, vector<16x128xf32>
      tpu.vector_store %arg5[%c0_14, %c0_15], %23 {strides = array<i32>} : memref<16x128xf32, #tpu.memory_space<vmem>>, vector<16x128xf32>,
    } else {
    }
    %cst = arith.constant 5.000000e+03 : f32
    %3 = math.log1p %cst : f32
    %cst_1 = arith.constant 1.000000e+00 : f32
    %4 = arith.divf %cst_1, %3 : f32
    %c0 = arith.constant 0 : index
    %c0_2 = arith.constant 0 : index
    %5 = vector.load %arg2[%c0, %c0_2] : memref<16x128xf32, #tpu.memory_space<vmem>>, vector<16x128xf32>
    %cst_3 = arith.constant 5.000000e+03 : f32
    %6 = vector.broadcast %cst_3 : f32 to vector<16x128xf32>
    %7 = arith.mulf %6, %5 : vector<16x128xf32>
    %8 = math.log1p %7 : vector<16x128xf32>
    %c0_4 = arith.constant 0 : index
    %c0_5 = arith.constant 0 : index
    %9 = vector.load %arg3[%c0_4, %c0_5] : memref<16x128xf32, #tpu.memory_space<vmem>>, vector<16x128xf32>
    %cst_6 = arith.constant 5.000000e+03 : f32
    %10 = vector.broadcast %cst_6 : f32 to vector<16x128xf32>
    %11 = arith.mulf %10, %9 : vector<16x128xf32>
    %12 = math.log1p %11 : vector<16x128xf32>
    %13 = arith.subf %8, %12 : vector<16x128xf32>
    %14 = math.absf %13 : vector<16x128xf32>
    %15 = vector.broadcast %4 : f32 to vector<16x128xf32>
    %16 = arith.mulf %14, %15 : vector<16x128xf32>
    %c0_7 = arith.constant 0 : index
    %c0_8 = arith.constant 0 : index
    %17 = vector.load %arg5[%c0_7, %c0_8] : memref<16x128xf32, #tpu.memory_space<vmem>>, vector<16x128xf32>
    %18 = arith.addf %17, %16 : vector<16x128xf32>
    %c0_9 = arith.constant 0 : index
    %c0_10 = arith.constant 0 : index
    %19 = vector.load %arg5[%c0_9, %c0_10] : memref<16x128xf32, #tpu.memory_space<vmem>>, vector<16x128xf32>
    tpu.vector_store %arg5[%c0_9, %c0_10], %18 {strides = array<i32>} : memref<16x128xf32, #tpu.memory_space<vmem>>, vector<16x128xf32>,
    %c0_i32_11 = arith.constant 0 : i32
    %20 = arith.cmpi eq, %arg1, %c0_i32_11 : i32
    %21 = arith.extui %20 : i1 to i32
    %c0_i32_12 = arith.constant 0 : i32
    %22 = arith.cmpi ne, %21, %c0_i32_12 : i32
    scf.if %22 {
      %c0_13 = arith.constant 0 : index
      %c0_14 = arith.constant 0 : index
      %23 = vector.load %arg5[%c0_13, %c0_14] : memref<16x128xf32, #tpu.memory_space<vmem>>, vector<16x128xf32>
      %24 = vector.shape_cast %23 : vector<16x128xf32> to vector<1x16x128xf32>
      %cst_15 = arith.constant dense<0.000000e+00> : vector<1xf32>
      %25 = vector.multi_reduction <add>, %24, %cst_15 [1, 2] : vector<1x16x128xf32> to vector<1xf32>
      %26 = vector.shape_cast %25 : vector<1xf32> to vector<1x1x1xf32>
      %27 = vector.extract %26[0, 0, 0] : f32 from vector<1x1x1xf32>
      %c0_16 = arith.constant 0 : index
      %c0_17 = arith.constant 0 : index
      %28 = memref.load %arg4[%c0_16, %c0_17] : memref<1x1xf32, #tpu.memory_space<smem>>
      memref.store %27, %arg4[%c0_16, %c0_17] : memref<1x1xf32, #tpu.memory_space<smem>>
    } else {
    }
    return
  }
  func.func @transform_0(%arg0: i32, %arg1: i32) -> (i32, i32) {
    %c1_i32 = arith.constant 1 : i32
    %0 = arith.muli %arg0, %c1_i32 : i32
    %1 = arith.addi %0, %arg1 : i32
    %c0_i32 = arith.constant 0 : i32
    %2 = arith.minsi %1, %c0_i32 : i32
    %c0_i32_0 = arith.constant 0 : i32
    %c0_i32_1 = arith.constant 0 : i32
    return %2, %c0_i32_0 : i32, i32
  }
  func.func @transform_1(%arg0: i32, %arg1: i32) -> (i32, i32) {
    %c1_i32 = arith.constant 1 : i32
    %0 = arith.muli %arg0, %c1_i32 : i32
    %1 = arith.addi %0, %arg1 : i32
    %c0_i32 = arith.constant 0 : i32
    %2 = arith.minsi %1, %c0_i32 : i32
    %c0_i32_0 = arith.constant 0 : i32
    %c0_i32_1 = arith.constant 0 : i32
    return %2, %c0_i32_0 : i32, i32
  }
  func.func @transform_2(%arg0: i32, %arg1: i32) -> (i32, i32) {
    %c0_i32 = arith.constant 0 : i32
    %c0_i32_0 = arith.constant 0 : i32
    return %arg0, %c0_i32 : i32, i32
  }
}

</mosaic_0001>

<bundles_post_ra>
// kernel: tpu_custom_call.1
= control target key start
LH: loop header
LB: loop body
LE: loop exit
PB: predicated region body
PF: predicated region fallthrough
CT: control target
= control target key end

     0   :  { %7 = vsyncpa [#allocation4], 0  ;;  %s295_s0 = inlined_call_operand.hbm [shape: f32[16,128], index: 0, kind: input, shape index: {}]   ;;  %s296_s1 = inlined_call_operand.hbm [shape: f32[16,128], index: 1, kind: input, shape index: {}]   ;;  %s297_s2 = inlined_call_operand.hbm [shape: f32[1,1], index: 2, kind: output, shape index: {}]  }
   0x1   :  { %8 = vsyncpa [#allocation7], 0 }
   0x2   :  { %9 = vsyncpa [#allocation5], 0  ;;  %s233_s9 = smov [#allocation3]   ;;  %s173_s13 = scalar_lea.hbm %s295_s0, 256 }
   0x3   :  { %s21_s10 = sshll.u32 %s233_s9, 4  ;;  %p174_p0 = scmp.ne.s32.totalorder %s295_s0, %s173_s13  ;;  %s22_s10 = int_to_ptr.vmem [resolvable:$true] %s21_s10 }
   0x4   :  { %p177_p1 = scmp.lt.u32.totalorder %s173_s13, %s295_s0 }
   0x6   :  { %p179_p2 = pnand %p177_p1, %p174_p0 }
   0x8   :  { %182 = shalt.err (!%p179_p2)
}
   0x9   :  { %s183_s18 = scalar_lea.vmem %s22_s10, 256  ;;  %p188_p4 = scmp.lt.s32.totalorder %s22_s10, %s22_s10 }
   0xa   :  { %p184_p3 = scmp.ne.s32.totalorder %s22_s10, %s183_s18  ;;  %p189_p5 = scmp.lt.s32.totalorder %s183_s18, %s183_s18 }
   0xc   :  { %p190_p6 = por %p189_p5, %p188_p4 }
   0xe   :  { %p191_p7 = pnand %p190_p6, %p184_p3 }
  0x10   :  { %194 = shalt.err (!%p191_p7)
}
  0x11   :  { %s234_s19 = smov 128   ;;  %s235_s20 = smov 8  }
  0x12   :  { %27 = dma.hbm_to_vmem [thread:$0]  %s295_s0, 256, %s22_s10, [#allocation4], %s234_s19, %s234_s19, %s235_s20  }
  0x13   :  { %s236_s23 = smov [#allocation6]   ;;  %s195_s27 = scalar_lea.hbm %s296_s1, 256 }
  0x14   :  { %s39_s24 = sshll.u32 %s236_s23, 4  ;;  %p196_p8 = scmp.ne.s32.totalorder %s296_s1, %s195_s27  ;;  %s40_s24 = int_to_ptr.vmem [resolvable:$true] %s39_s24 }
  0x15   :  { %p199_p9 = scmp.lt.u32.totalorder %s195_s27, %s296_s1 }
  0x17   :  { %p201_p10 = pnand %p199_p9, %p196_p8 }
  0x19   :  { %204 = shalt.err (!%p201_p10)
}
  0x1a   :  { %s205_s4 = scalar_lea.vmem %s40_s24, 256  ;;  %p210_p12 = scmp.lt.s32.totalorder %s40_s24, %s40_s24 }
  0x1b   :  { %p206_p11 = scmp.ne.s32.totalorder %s40_s24, %s205_s4  ;;  %p211_p13 = scmp.lt.s32.totalorder %s205_s4, %s205_s4 }
  0x1d   :  { %p212_p0 = por %p211_p13, %p210_p12 }
  0x1f   :  { %p213_p1 = pnand %p212_p0, %p206_p11 }
  0x21   :  { %216 = shalt.err (!%p213_p1)
}
  0x22   :  { %45 = dma.hbm_to_vmem [thread:$0]  %s296_s1, 256, %s40_s24, [#allocation7], %s234_s19, %s234_s19, %s235_s20  }
  0x23   :  { %227 = dma.done.wait [#allocation4], 256  }
  0x24   :  { %228 = vsyncadd [#allocation4], 4294967040 }
  0x25   :  { %229 = dma.done.wait [#allocation7], 256  }
  0x26   :  { %230 = vsyncadd [#allocation7], 4294967040  ;;  %v66_v0 = vld [vmem:[#allocation3] sm:$0xff]  ;;  %v67_v1 = vld [vmem:[#allocation3 + $0x8] sm:$0xff]  ;;  %s217_s8 = scalar_lea.hbm %s297_s2, 16 }
  0x27   :  { %v88_v2 = vld [vmem:[#allocation6] sm:$0xff]  ;;  %v68_v3 = vmul.f32 5000.0, %v66_v0  ;;  %v69_v4 = vmul.f32 5000.0, %v67_v1  ;;  %v89_v5 = vld [vmem:[#allocation6 + $0x8] sm:$0xff]  ;;  %p218_p2 = scmp.ne.s32.totalorder %s297_s2, %s217_s8  ;;  %p221_p3 = scmp.lt.u32.totalorder %s217_s8, %s297_s2 }
  0x28   :  { %v90_v6 = vmul.f32 5000.0, %v88_v2  ;;  %v91_v9 = vmul.f32 5000.0, %v89_v5 }
  0x29   :  { %v70_v7 = vadd.f32 1.0, %v68_v3  ;;  %v79_v8 = vadd.f32 1.0, %v69_v4  ;;  %v73_v11 = vmul.f32 -0.5, %v68_v3  ;;  %v82_v13 = vmul.f32 -0.5, %v69_v4  ;;  %p223_p4 = pnand %p221_p3, %p218_p2 }
  0x2a   :  { %v92_v10 = vadd.f32 1.0, %v90_v6  ;;  %v101_v12 = vadd.f32 1.0, %v91_v9  ;;  %v95_v14 = vmul.f32 -0.5, %v90_v6  ;;  %v104_v16 = vmul.f32 -0.5, %v91_v9 }
  0x2b   :  { %165 = vlog2.f32 %v70_v7  ;;  %v74_v15 = vadd.f32 1.0, %v73_v11  ;;  %v76_v17 = vand.u32 2147483647, %v68_v3  ;;  %v83_v18 = vadd.f32 1.0, %v82_v13 }
  0x2c   :  { %167 = vlog2.f32 %v79_v8  ;;  %v96_v19 = vadd.f32 1.0, %v95_v14  ;;  %v85_v20 = vand.u32 2147483647, %v69_v4  ;;  %v98_v21 = vand.u32 2147483647, %v90_v6 }
  0x2d   :  { %169 = vlog2.f32 %v92_v10  ;;  %v75_v22 = vmul.f32 %v74_v15, %v68_v3  ;;  %v105_v23 = vadd.f32 1.0, %v104_v16  ;;  %vm277_vm0 = vcmp.lt.f32.partialorder %v76_v17, 0.0004427343 }
  0x2e   :  { %171 = vlog2.f32 %v101_v12  ;;  %v107_v26 = vand.u32 2147483647, %v91_v9  ;;  %v84_v29 = vmul.f32 %v83_v18, %v69_v4  ;;  %v97_v30 = vmul.f32 %v96_v19, %v90_v6 }
  0x2f   :  { %vm86_vm1 = vcmp.lt.f32.partialorder %v85_v20, 0.0004427343  ;;  %vm99_vm2 = vcmp.lt.f32.partialorder %v98_v21, 0.0004427343  ;;  %v106_v35 = vmul.f32 %v105_v23, %v91_v9 }
  0x30   :  { %vm108_vm3 = vcmp.lt.f32.partialorder %v107_v26, 0.0004427343 }
  0x35   :  { %v166_v24 = vpop.eup %165 }
  0x36   :  { %v168_v27 = vpop.eup %167  ;;  %v72_v28 = vmul.f32 0.6931472, %v166_v24 }
  0x37   :  { %v170_v31 = vpop.eup %169  ;;  %v81_v32 = vmul.f32 0.6931472, %v168_v27 }
  0x38   :  { %v78_v33 = vsel %vm277_vm0, %v75_v22, %v72_v28  ;;  %v94_v34 = vmul.f32 0.6931472, %v170_v31  ;;  %v172_v36 = vpop.eup %171 }
  0x39   :  { %v87_v37 = vsel %vm86_vm1, %v84_v29, %v81_v32  ;;  %v103_v39 = vmul.f32 0.6931472, %v172_v36 }
  0x3a   :  { %v100_v38 = vsel %vm99_vm2, %v97_v30, %v94_v34 }
  0x3b   :  { %v110_v40 = vsub.f32 %v78_v33, %v100_v38  ;;  %v109_v41 = vsel %vm108_vm3, %v106_v35, %v103_v39 }
  0x3c   :  { %v111_v42 = vsub.f32 %v87_v37, %v109_v41 }
  0x3d   :  { %v112_v43 = vand.u32 2147483647, %v110_v40 }
  0x3e   :  { %v113_v44 = vand.u32 2147483647, %v111_v42 }
  0x3f   :  { %v114_v45 = vmul.f32 0.117406815, %v112_v43 }
  0x40   :  { %v115_v46 = vmul.f32 0.117406815, %v113_v44 }
  0x42   :  { %v127_v47 = vadd.f32 %v115_v46, %v114_v45 }
  0x44   :  { %128 = vadd.xlane.f32.xlu0 %v127_v47 }
  0xd1   :  { %v129_v48 = vpop.xlane.xlu0 %128 }
  0xd2   :  { %v130_v49 = vrot.slane %v129_v48, 4 }
  0xd4   :  { %v131_v50 = vadd.f32 %v130_v49, %v129_v48 }
  0xd6   :  { %v132_v51 = vrot.slane %v131_v50, 2 }
  0xd8   :  { %v133_v52 = vadd.f32 %v132_v51, %v131_v50 }
  0xda   :  { %v134_v53 = vrot.slane %v133_v52, 1 }
  0xdc   :  { %v135_v54 = vadd.f32 %v134_v53, %v133_v52 }
  0xde   :  { %158 = vpush %v135_v54 }
 0x10f   :  { %s159_s1 = spop %158 }
 0x110   :  { %138 = sst [smem:[#allocation8]] %s159_s1 }
 0x111   :  { %226 = shalt.err (!%p223_p4)
}
 0x112   :  { %s237_s13 = smov [#allocation8]  }
 0x113   :  { %146 = dma.smem_to_hbm %s237_s13, 16, %s297_s2, [#allocation5]  }
 0x114   :  { %231 = dma.done.wait [#allocation5], 16  }
 0x115   :  { %232 = vsyncadd [#allocation5], 4294967280 }
 0x116   :  { %150 = sfence }
 0x117   :  { %151 = vsyncpa [#allocation4], 1 }
 0x118   :  { %152 = vsyncpa [#allocation7], 1 }
 0x119   :  { %153 = vsyncpa [#allocation5], 1 }

</bundles_post_ra>
